<compile_context>
chip_gen: v7x
topology: tpu7x:2x2x1
jax: 0.10.0
libtpu: 0.0.40
codegen_flags: <defaults>
</compile_context>

<pallas_src>
import jax
import jax.numpy as jnp
from jax.experimental import pallas as pl
from jax.experimental.pallas import tpu as pltpu


LN_EPS = 1e-5  # nn.LayerNorm default


def policy_net_kernel(x_ref, w1_ref, b1_ref, g_ref, beta_ref, w2_ref, b2_ref,
                      o_ref):
    x = x_ref[...]          # (B, D_in)
    w1 = w1_ref[...]        # (D_in, 128)
    d_in = x.shape[1]

    # ---- Linear 1 as VPU broadcast-FMAs (tiny K: skip the MXU round-trip) ----
    # h = b1 + sum_k x[:, k] (outer) w1[k, :]   -> (B, 128)
    h = b1_ref[...] + x[:, 0:1] * w1[0:1, :]
    for k in range(1, d_in):
        h = h + x[:, k:k + 1] * w1[k:k + 1, :]
    h = h.astype(jnp.float32)

    # ---- Dropout(p=0.0): identity ----

    # ---- LayerNorm over last dim (128); 1/128 is an exact power of two ----
    inv_width = 1.0 / h.shape[-1]
    mean = jnp.sum(h, axis=-1, keepdims=True) * inv_width
    centered = h - mean
    var = jnp.sum(centered * centered, axis=-1, keepdims=True) * inv_width
    inv = jax.lax.rsqrt(var + LN_EPS)
    h = centered * inv * g_ref[...] + beta_ref[...]

    # ---- ReLU ----
    h = jnp.maximum(h, 0.0)

    # ---- Linear 2: (B, 128) @ (128, D_out) + (1, D_out); K=128 fills MXU ----
    logits = jnp.dot(h, w2_ref[...],
                     preferred_element_type=jnp.float32) + b2_ref[...]

    d_out = logits.shape[-1]
    if d_out == 2:
        # Exact 2-way softmax as a sigmoid: softmax([l0, l1]) ==
        # [sigmoid(l0 - l1), 1 - sigmoid(l0 - l1)]. No masked (B,2) lane
        # reduces, exp stays on the EUP slot, rows sum to 1 by construction.
        z = logits[:, 0:1] - logits[:, 1:2]          # (B, 1)
        p0 = 1.0 / (1.0 + jnp.exp(-z))               # stable: saturates cleanly
        probs = jnp.concatenate([p0, 1.0 - p0], axis=-1)
        o_ref[...] = probs.astype(o_ref.dtype)
    else:
        # General path: numerically stabilized softmax with an exact divide.
        m = jnp.max(logits, axis=-1, keepdims=True)
        e = jnp.exp(logits - m)
        denom = jnp.sum(e, axis=-1, keepdims=True)
        o_ref[...] = (e / denom).astype(o_ref.dtype)


def policy_net_forward(x, w1, b1, gamma, beta, w2, b2, *, block_b=2048):
    """Forward pass of the policy net. x: (B, D_in) -> probs (B, D_out)."""
    B, D_in = x.shape
    D_width = w1.shape[1]
    D_out = w2.shape[1]
    vmem = pl.BlockSpec(memory_space=pltpu.MemorySpace.VMEM)

    if B <= block_b:
        # Small/medium-batch path: single invocation, all operands resident in
        # VMEM (weights are ~66 KB; activations well under the scoped limit).
        # For per-step policy eval (B ~ 8) the wall time is launch + weight DMA;
        # batch multiple environment states per call to amortize it.
        return pl.pallas_call(
            policy_net_kernel,
            out_shape=jax.ShapeDtypeStruct((B, D_out), jnp.float32),
            in_specs=[vmem] * 7,
            out_specs=vmem,
        )(x, w1, b1, gamma, beta, w2, b2)

    # Large-batch path: tile the batch axis; "parallel" lets the grid shard
    # across both TensorCores on v7x. Weights stay whole in VMEM per tile.
    assert B % block_b == 0, "pad the rollout batch to a multiple of block_b"
    n_tiles = B // block_b
    # v7x megacore balance: prefer an even tile count so both TCs are fed.
    if n_tiles % 2 == 1 and block_b % 16 == 0 and B % (block_b // 2) == 0:
        block_b //= 2
        n_tiles = B // block_b
    grid = (n_tiles,)

    return pl.pallas_call(
        policy_net_kernel,
        out_shape=jax.ShapeDtypeStruct((B, D_out), jnp.float32),
        grid=grid,
        in_specs=[
            pl.BlockSpec((block_b, D_in), lambda i: (i, 0)),
            pl.BlockSpec((D_in, D_width), lambda i: (0, 0)),
            pl.BlockSpec((1, D_width), lambda i: (0, 0)),
            pl.BlockSpec((1, D_width), lambda i: (0, 0)),
            pl.BlockSpec((1, D_width), lambda i: (0, 0)),
            pl.BlockSpec((D_width, D_out), lambda i: (0, 0)),
            pl.BlockSpec((1, D_out), lambda i: (0, 0)),
        ],
        out_specs=pl.BlockSpec((block_b, D_out), lambda i: (i, 0)),
        compiler_params=pltpu.CompilerParams(
            dimension_semantics=("parallel",),
            # Raises v5e's 16 MiB scoped-VMEM default; within limits everywhere.
            vmem_limit_bytes=32 * 1024 * 1024,
        ),
    )(x, w1, b1, gamma, beta, w2, b2)


def init_params(key, D_in, D_out, D_width=128):
    k1, k2, k3, k4 = jax.random.split(key, 4)
    # Deterministic synthetic init (uniform like PyTorch's default Linear init).
    bound1 = 1.0 / jnp.sqrt(D_in)
    bound2 = 1.0 / jnp.sqrt(D_width)
    w1 = jax.random.uniform(k1, (D_in, D_width), jnp.float32, -bound1, bound1)
    b1 = jax.random.uniform(k2, (1, D_width), jnp.float32, -bound1, bound1)
    gamma = jnp.ones((1, D_width), jnp.float32)   # LayerNorm weight init
    beta = jnp.zeros((1, D_width), jnp.float32)   # LayerNorm bias init
    w2 = jax.random.uniform(k3, (D_width, D_out), jnp.float32, -bound2, bound2)
    b2 = jax.random.uniform(k4, (1, D_out), jnp.float32, -bound2, bound2)
    return w1, b1, gamma, beta, w2, b2


def reference_forward(x, w1, b1, gamma, beta, w2, b2):
    h = x @ w1 + b1
    mean = h.mean(-1, keepdims=True)
    var = ((h - mean) ** 2).mean(-1, keepdims=True)
    h = (h - mean) / jnp.sqrt(var + LN_EPS) * gamma + beta
    h = jnp.maximum(h, 0.0)
    logits = h @ w2 + b2
    return jax.nn.softmax(logits, axis=1)


if __name__ == "__main__":
    # CartPole-v1: observation dim 4, action dim 2.
    D_in, D_out = 4, 2
    ROWSUM_TOL = 1e-5     # softmax/sigmoid is exact now; rows sum to 1 to f32 ulp
    REF_TOL = 2e-3        # covers MXU reduced-precision f32 matmul vs XLA reference

    key = jax.random.PRNGKey(0)
    kx, kp, kx2 = jax.random.split(key, 3)
    params = init_params(kp, D_in, D_out)

    # --- Small batch (typical per-step policy eval): single-invocation path.
    B = 8
    x = jax.random.normal(kx, (B, D_in), jnp.float32)
    y = jax.block_until_ready(policy_net_forward(x, *params))
    y_ref = reference_forward(x, *params)
    assert y.shape == (B, D_out)
    assert jnp.allclose(jnp.sum(y, axis=1), 1.0, atol=ROWSUM_TOL)
    assert jnp.allclose(y, y_ref, atol=REF_TOL, rtol=REF_TOL)

    # --- Large batch (batched rollout states): tiled, megacore-parallel path.
    B2 = 4096
    x2 = jax.random.normal(kx2, (B2, D_in), jnp.float32)
    y2 = jax.block_until_ready(policy_net_forward(x2, *params, block_b=2048))
    y2_ref = reference_forward(x2, *params)
    assert y2.shape == (B2, D_out)
    assert jnp.allclose(jnp.sum(y2, axis=1), 1.0, atol=ROWSUM_TOL)
    assert jnp.allclose(y2, y2_ref, atol=REF_TOL, rtol=REF_TOL)

    print("KERNEL_OK")
</pallas_src>

<mosaic_0001>
module attributes {stable_mosaic.version = 11 : i64} {
  func.func @policy_net_kernel(%arg0: memref<8x4xf32, #tpu.memory_space<vmem>>, %arg1: memref<4x128xf32, #tpu.memory_space<vmem>>, %arg2: memref<1x128xf32, #tpu.memory_space<vmem>>, %arg3: memref<1x128xf32, #tpu.memory_space<vmem>>, %arg4: memref<1x128xf32, #tpu.memory_space<vmem>>, %arg5: memref<128x2xf32, #tpu.memory_space<vmem>>, %arg6: memref<1x2xf32, #tpu.memory_space<vmem>>, %arg7: memref<8x2xf32, #tpu.memory_space<vmem>>) attributes {dimension_semantics = [], scalar_prefetch = 0 : i64, scratch_operands = 0 : i64, tpu.core_type = #tpu.core_type<tc>} {
    %c0 = arith.constant 0 : index
    %c0_0 = arith.constant 0 : index
    %0 = vector.load %arg0[%c0, %c0_0] : memref<8x4xf32, #tpu.memory_space<vmem>>, vector<8x4xf32>
    %c0_1 = arith.constant 0 : index
    %c0_2 = arith.constant 0 : index
    %1 = vector.load %arg1[%c0_1, %c0_2] : memref<4x128xf32, #tpu.memory_space<vmem>>, vector<4x128xf32>
    %c0_3 = arith.constant 0 : index
    %c0_4 = arith.constant 0 : index
    %2 = vector.load %arg2[%c0_3, %c0_4] : memref<1x128xf32, #tpu.memory_space<vmem>>, vector<1x128xf32>
    %3 = vector.extract_strided_slice %0 {offsets = [0, 0], sizes = [8, 1], strides = [1, 1]} : vector<8x4xf32> to vector<8x1xf32>
    %4 = vector.extract_strided_slice %1 {offsets = [0, 0], sizes = [1, 128], strides = [1, 1]} : vector<4x128xf32> to vector<1x128xf32>
    %5 = vector.broadcast %3 : vector<8x1xf32> to vector<8x128xf32>
    %6 = vector.broadcast %4 : vector<1x128xf32> to vector<8x128xf32>
    %7 = arith.mulf %5, %6 : vector<8x128xf32>
    %8 = vector.broadcast %2 : vector<1x128xf32> to vector<8x128xf32>
    %9 = arith.addf %8, %7 : vector<8x128xf32>
    %10 = vector.extract_strided_slice %0 {offsets = [0, 1], sizes = [8, 1], strides = [1, 1]} : vector<8x4xf32> to vector<8x1xf32>
    %11 = vector.extract_strided_slice %1 {offsets = [1, 0], sizes = [1, 128], strides = [1, 1]} : vector<4x128xf32> to vector<1x128xf32>
    %12 = vector.broadcast %10 : vector<8x1xf32> to vector<8x128xf32>
    %13 = vector.broadcast %11 : vector<1x128xf32> to vector<8x128xf32>
    %14 = arith.mulf %12, %13 : vector<8x128xf32>
    %15 = arith.addf %9, %14 : vector<8x128xf32>
    %16 = vector.extract_strided_slice %0 {offsets = [0, 2], sizes = [8, 1], strides = [1, 1]} : vector<8x4xf32> to vector<8x1xf32>
    %17 = vector.extract_strided_slice %1 {offsets = [2, 0], sizes = [1, 128], strides = [1, 1]} : vector<4x128xf32> to vector<1x128xf32>
    %18 = vector.broadcast %16 : vector<8x1xf32> to vector<8x128xf32>
    %19 = vector.broadcast %17 : vector<1x128xf32> to vector<8x128xf32>
    %20 = arith.mulf %18, %19 : vector<8x128xf32>
    %21 = arith.addf %15, %20 : vector<8x128xf32>
    %22 = vector.extract_strided_slice %0 {offsets = [0, 3], sizes = [8, 1], strides = [1, 1]} : vector<8x4xf32> to vector<8x1xf32>
    %23 = vector.extract_strided_slice %1 {offsets = [3, 0], sizes = [1, 128], strides = [1, 1]} : vector<4x128xf32> to vector<1x128xf32>
    %24 = vector.broadcast %22 : vector<8x1xf32> to vector<8x128xf32>
    %25 = vector.broadcast %23 : vector<1x128xf32> to vector<8x128xf32>
    %26 = arith.mulf %24, %25 : vector<8x128xf32>
    %27 = arith.addf %21, %26 : vector<8x128xf32>
    %cst = arith.constant dense<0.000000e+00> : vector<8xf32>
    %28 = vector.multi_reduction <add>, %27, %cst [1] : vector<8x128xf32> to vector<8xf32>
    %29 = vector.shape_cast %28 : vector<8xf32> to vector<8x1xf32>
    %cst_5 = arith.constant 7.812500e-03 : f32
    %30 = vector.broadcast %cst_5 : f32 to vector<8x1xf32>
    %31 = arith.mulf %29, %30 : vector<8x1xf32>
    %32 = vector.broadcast %31 : vector<8x1xf32> to vector<8x128xf32>
    %33 = arith.subf %27, %32 : vector<8x128xf32>
    %34 = arith.mulf %33, %33 : vector<8x128xf32>
    %cst_6 = arith.constant dense<0.000000e+00> : vector<8xf32>
    %35 = vector.multi_reduction <add>, %34, %cst_6 [1] : vector<8x128xf32> to vector<8xf32>
    %36 = vector.shape_cast %35 : vector<8xf32> to vector<8x1xf32>
    %cst_7 = arith.constant 7.812500e-03 : f32
    %37 = vector.broadcast %cst_7 : f32 to vector<8x1xf32>
    %38 = arith.mulf %36, %37 : vector<8x1xf32>
    %cst_8 = arith.constant 9.99999974E-6 : f32
    %39 = vector.broadcast %cst_8 : f32 to vector<8x1xf32>
    %40 = arith.addf %38, %39 : vector<8x1xf32>
    %41 = math.rsqrt %40 : vector<8x1xf32>
    %42 = vector.broadcast %41 : vector<8x1xf32> to vector<8x128xf32>
    %43 = arith.mulf %33, %42 : vector<8x128xf32>
    %c0_9 = arith.constant 0 : index
    %c0_10 = arith.constant 0 : index
    %44 = vector.load %arg3[%c0_9, %c0_10] : memref<1x128xf32, #tpu.memory_space<vmem>>, vector<1x128xf32>
    %45 = vector.broadcast %44 : vector<1x128xf32> to vector<8x128xf32>
    %46 = arith.mulf %43, %45 : vector<8x128xf32>
    %c0_11 = arith.constant 0 : index
    %c0_12 = arith.constant 0 : index
    %47 = vector.load %arg4[%c0_11, %c0_12] : memref<1x128xf32, #tpu.memory_space<vmem>>, vector<1x128xf32>
    %48 = vector.broadcast %47 : vector<1x128xf32> to vector<8x128xf32>
    %49 = arith.addf %46, %48 : vector<8x128xf32>
    %cst_13 = arith.constant 0.000000e+00 : f32
    %50 = vector.broadcast %cst_13 : f32 to vector<8x128xf32>
    %51 = arith.maximumf %49, %50 : vector<8x128xf32>
    %c0_14 = arith.constant 0 : index
    %c0_15 = arith.constant 0 : index
    %52 = vector.load %arg5[%c0_14, %c0_15] : memref<128x2xf32, #tpu.memory_space<vmem>>, vector<128x2xf32>
    %cst_16 = arith.constant dense<0.000000e+00> : vector<8x2xf32>
    %53 = tpu.matmul %51, %52, %cst_16 {dimension_numbers = #tpu.dot_dimension_numbers<[1], [0], [0], [1], [0, 0, 1, 1], [], []>} : vector<8x128xf32>, vector<128x2xf32>, vector<8x2xf32> -> vector<8x2xf32>
    %c0_17 = arith.constant 0 : index
    %c0_18 = arith.constant 0 : index
    %54 = vector.load %arg6[%c0_17, %c0_18] : memref<1x2xf32, #tpu.memory_space<vmem>>, vector<1x2xf32>
    %55 = vector.broadcast %54 : vector<1x2xf32> to vector<8x2xf32>
    %56 = arith.addf %53, %55 : vector<8x2xf32>
    %57 = vector.extract_strided_slice %56 {offsets = [0, 0], sizes = [8, 1], strides = [1, 1]} : vector<8x2xf32> to vector<8x1xf32>
    %58 = vector.extract_strided_slice %56 {offsets = [0, 1], sizes = [8, 1], strides = [1, 1]} : vector<8x2xf32> to vector<8x1xf32>
    %59 = arith.subf %57, %58 : vector<8x1xf32>
    %cst_19 = arith.constant 0.000000e+00 : f32
    %60 = vector.broadcast %cst_19 : f32 to vector<8x1xf32>
    %61 = arith.subf %60, %59 : vector<8x1xf32>
    %62 = math.exp %61 : vector<8x1xf32>
    %cst_20 = arith.constant 1.000000e+00 : f32
    %63 = vector.broadcast %cst_20 : f32 to vector<8x1xf32>
    %64 = arith.addf %63, %62 : vector<8x1xf32>
    %cst_21 = arith.constant 1.000000e+00 : f32
    %65 = vector.broadcast %cst_21 : f32 to vector<8x1xf32>
    %66 = arith.divf %65, %64 : vector<8x1xf32>
    %cst_22 = arith.constant 1.000000e+00 : f32
    %67 = vector.broadcast %cst_22 : f32 to vector<8x1xf32>
    %68 = arith.subf %67, %66 : vector<8x1xf32>
    %69 = tpu.concatenate %66, %68 in 1 : vector<8x1xf32>, vector<8x1xf32> -> vector<8x2xf32>
    %c0_23 = arith.constant 0 : index
    %c0_24 = arith.constant 0 : index
    %70 = vector.load %arg7[%c0_23, %c0_24] : memref<8x2xf32, #tpu.memory_space<vmem>>, vector<8x2xf32>
    tpu.vector_store %arg7[%c0_23, %c0_24], %69 {strides = array<i32>} : memref<8x2xf32, #tpu.memory_space<vmem>>, vector<8x2xf32>,
    return
  }
}

</mosaic_0001>

<bundles_post_ra>
// kernel: tpu_custom_call.1
= control target key start
LH: loop header
LB: loop body
LE: loop exit
PB: predicated region body
PF: predicated region fallthrough
CT: control target
= control target key end

     0   :  { %v321_v0 = vmov 0   ;;  %v322_v2 = vmov 2   ;;  %v323_v3 = vmov 1   ;;  %v324_v4 = vmov 3   ;;  %s328_s15 = smov 127   ;;  %s439_s0 = inlined_call_operand.vmem [shape: f32[8,4], index: 0, kind: input, shape index: {}]   ;;  %s440_s1 = inlined_call_operand.vmem [shape: f32[4,128], index: 1, kind: input, shape index: {}]   ;;  %s441_s2 = inlined_call_operand.vmem [shape: f32[1,128], index: 2, kind: input, shape index: {}]   ;;  %s442_s5 = inlined_call_operand.vmem [shape: f32[128,2], index: 5, kind: input, shape index: {}]   ;;  %s443_s3 = inlined_call_operand.vmem [shape: f32[1,128], index: 3, kind: input, shape index: {}]   ;;  %s444_s4 = inlined_call_operand.vmem [shape: f32[1,128], index: 4, kind: input, shape index: {}]   ;;  %s445_s6 = inlined_call_operand.vmem [shape: f32[1,2], index: 6, kind: input, shape index: {}]   ;;  %s446_s7 = inlined_call_operand.vmem [shape: f32[8,2], index: 7, kind: output, shape index: {}]  }
   0x1   :  { %310 = vset.pattern.permute.xlu0 %v321_v0  ;;  %v26_v1 = vld [vmem:[%s439_s0] sm:$0xff]  ;;  %312 = vset.pattern.permute.xlu1 %v322_v2  ;;  %v34_v5 = vlaneseq  ;;  %v325_v29 = vmov 0.0|0.0   ;;  %v105_v31 = vld [vmem:[%s442_s5 + $0x8] sm:$0xff]  ;;  %v106_v32 = vld [vmem:[%s442_s5 + $0x10] sm:$0xff]  ;;  %vm326_vm0 = vmmov 0   ;;  %v327_v51 = vmov 0.0  }
   0x2   :  { %31 = vperm.xlu0 %310, %v26_v1   ;;  %57 = vperm.xlu1 %312, %v26_v1   ;;  %v27_v8 = vld [vmem:[%s440_s1] sm:$0xf]  ;;  %v107_v34 = vld [vmem:[%s442_s5 + $0x18] sm:$0xff]  ;;  %v109_v41 = vld [vmem:[%s442_s5 + $0x28] sm:$0xff]  ;;  %vm213_vm1 = vcmask 7168   ;;  %vm215_vm2 = vcmask 15360  }
   0x3   :  { %v35_v6 = vshrl.u32 %v34_v5, 7  ;;  %v221_v17 = vld [vmem:[%s441_s2] ss:$0 sm:$0xff]  ;;  %277 = vmatprep.subr.bf16.mxu0 %v325_v29  ;;  %v281_v35 = vpack.c.bf16 %v107_v34, %v106_v32  ;;  %v110_v43 = vld [vmem:[%s442_s5 + $0x30] sm:$0xff]  ;;  %v111_v44 = vld [vmem:[%s442_s5 + $0x38] sm:$0xff]  ;;  %274 = vmatprep.mubr.msk.f32.mxu0 %vm326_vm0, %v327_v51 }
   0x4   :  { %v104_v30 = vld [vmem:[%s442_s5] sm:$0xff]  ;;  %v287_v45 = vpack.c.bf16 %v111_v44, %v110_v43  ;;  %v113_v47 = vld [vmem:[%s442_s5 + $0x48] sm:$0xff]  ;;  %v114_v49 = vld [vmem:[%s442_s5 + $0x50] sm:$0xff] }
   0x5   :  { %v36_v7 = vsub.s32 0, %v35_v6  ;;  %v52_v10 = vsub.s32 1, %v35_v6  ;;  %v62_v12 = vsub.s32 2, %v35_v6  ;;  %v72_v14 = vsub.s32 3, %v35_v6  ;;  %v108_v40 = vld [vmem:[%s442_s5 + $0x20] sm:$0xff]  ;;  %v115_v50 = vld [vmem:[%s442_s5 + $0x58] sm:$0xff] }
   0x6   :  { %311 = vset.pattern.permute.xlu0 %v323_v3  ;;  %313 = vset.pattern.permute.xlu1 %v324_v4  ;;  %v278_v33 = vpack.c.bf16 %v105_v31, %v104_v30  ;;  %v284_v42 = vpack.c.bf16 %v109_v41, %v108_v40  ;;  %v112_v46 = vld [vmem:[%s442_s5 + $0x40] sm:$0xff]  ;;  %v293_v52 = vpack.c.bf16 %v115_v50, %v114_v49  ;;  %v117_v54 = vld [vmem:[%s442_s5 + $0x68] sm:$0xff]  ;;  %v118_v56 = vld [vmem:[%s442_s5 + $0x70] sm:$0xff] }
   0x7   :  { %47 = vperm.xlu0 %311, %v26_v1   ;;  %67 = vperm.xlu1 %313, %v26_v1   ;;  %v37_v9 = vrot.slane %v27_v8, %v36_v7  ;;  %v53_v16 = vrot.slane %v27_v8, %v52_v10  ;;  %v63_v18 = vrot.slane %v27_v8, %v62_v12  ;;  %v116_v53 = vld [vmem:[%s442_s5 + $0x60] sm:$0xff]  ;;  %v119_v57 = vld [vmem:[%s442_s5 + $0x78] sm:$0xff] }
   0x8   :  { %v73_v19 = vrot.slane %v27_v8, %v72_v14  ;;  %279 = vmatpush3.bf16.msra.mxu0 %v278_v33  ;;  %v290_v48 = vpack.c.bf16 %v113_v47, %v112_v46  ;;  %v296_v55 = vpack.c.bf16 %v117_v54, %v116_v53  ;;  %v299_v58 = vpack.c.bf16 %v119_v57, %v118_v56  ;;  %v222_v63 = vld [vmem:[%s443_s3] ss:$0 sm:$0xff]  ;;  %s329_s3 = smov 1  }
   0x9   :  { %280 = vmatprep.subr.bf16.mxu0 %v325_v29  ;;  %v223_v1 = vld [vmem:[%s444_s4] ss:$0 sm:$0xff] }
   0xa   :  { %v224_v5 = vld [vmem:[%s445_s6] ss:$0 sm:$0xff] }
   0xb   :  { %314 = vset.pattern.permute.xlu0 %v324_v4 }
   0xc   :  { %282 = vmatpush3.bf16.msra.mxu0 %v281_v35 }
   0xd   :  { %283 = vmatprep.subr.bf16.mxu0 %v325_v29 }
  0x10   :  { %285 = vmatpush3.bf16.msra.mxu0 %v284_v42 }
  0x11   :  { %286 = vmatprep.subr.bf16.mxu0 %v325_v29 }
  0x14   :  { %288 = vmatpush3.bf16.msra.mxu0 %v287_v45 }
  0x15   :  { %289 = vmatprep.subr.bf16.mxu0 %v325_v29 }
  0x18   :  { %291 = vmatpush3.bf16.msra.mxu0 %v290_v48 }
  0x19   :  { %292 = vmatprep.subr.bf16.mxu0 %v325_v29 }
  0x1c   :  { %294 = vmatpush3.bf16.msra.mxu0 %v293_v52 }
  0x1d   :  { %295 = vmatprep.subr.bf16.mxu0 %v325_v29 }
  0x20   :  { %297 = vmatpush3.bf16.msra.mxu0 %v296_v55 }
  0x21   :  { %298 = vmatprep.subr.bf16.mxu0 %v325_v29 }
  0x24   :  { %300 = vmatpush3.bf16.msra.mxu0 %v299_v58 }
  0x81   :  { %v32_v11 = vpop.permute.xlu0 %31  ;;  %v58_v13 = vpop.permute.xlu1 %57 }
  0x82   :  { %v38_v15 = vmul.f32 %v37_v9, %v32_v11  ;;  %v64_v24 = vmul.f32 %v63_v18, %v58_v13 }
  0x84   :  { %v45_v22 = vadd.f32 %v221_v17, %v38_v15 }
  0x86   :  { %v48_v20 = vpop.permute.xlu0 %47  ;;  %v68_v21 = vpop.permute.xlu1 %67 }
  0x87   :  { %v54_v23 = vmul.f32 %v53_v16, %v48_v20  ;;  %v74_v26 = vmul.f32 %v73_v19, %v68_v21 }
  0x89   :  { %v55_v25 = vadd.f32 %v54_v23, %v45_v22 }
  0x8b   :  { %v65_v27 = vadd.f32 %v64_v24, %v55_v25 }
  0x8d   :  { %v75_v28 = vadd.f32 %v74_v26, %v65_v27 }
  0x8f   :  { %76 = vadd.xlane.f32.xlu1 %v75_v28 }
 0x11c   :  { %v77_v36 = vpop.xlane.xlu1 %76 }
 0x11d   :  { %v78_v37 = vmul.f32 0.0078125, %v77_v36 }
 0x11f   :  { %v79_v38 = vsub.f32 %v75_v28, %v78_v37 }
 0x121   :  { %v80_v39 = vmul.f32 %v79_v38, %v79_v38 }
 0x123   :  { %81 = vadd.xlane.f32.xlu0 %v80_v39 }
 0x1b0   :  { %v82_v59 = vpop.xlane.xlu0 %81 }
 0x1b1   :  { %v83_v60 = vmul.f32 0.0078125, %v82_v59 }
 0x1b3   :  { %v84_v61 = vadd.f32 1e-05, %v83_v60 }
 0x1b5   :  { %315 = vrsqrt.f32 %v84_v61 }
 0x1bf   :  { %v316_v62 = vpop.eup %315 }
 0x1c0   :  { %v86_v0 = vmul.f32 %v316_v62, %v79_v38 }
 0x1c2   :  { %v94_v2 = vmul.f32 %v222_v63, %v86_v0 }
 0x1c4   :  { %v102_v3 = vadd.f32 %v223_v1, %v94_v2 }
 0x1c6   :  { %v103_v4 = vmax.f32 %v102_v3, 0.0 }
 0x1c8   :  { %275 = vmatmul.mubr.f32.vlgmr.msra.gmra.mrb[0].mxu0 %v103_v4 }
 0x29b   :  { %v193_v6 = vpop.f32.mrb[0].mxu0 }
 0x29c   :  { %v194_v7 = vadd.f32 %v224_v5, %v193_v6  ;;  %v276_v8 = vpop.f32.mrb[1].mxu0 }
 0x29e   :  { %198 = vrot.lane.b32.xlu0 %v194_v7, %s328_s15 }
 0x310   :  { %v199_v9 = vpop.permute.xlu0 %198 }
 0x311   :  { %v201_v10 = vsub.f32 %v194_v7, %v199_v9 }
 0x313   :  { %v202_v11 = vsub.f32 0.0, %v201_v10 }
 0x315   :  { %v203_v12 = vmul.f32 1.442695, %v202_v11 }
 0x317   :  { %317 = vpow2.f32 %v203_v12 }
 0x321   :  { %v318_v13 = vpop.eup %317 }
 0x322   :  { %v205_v14 = vadd.f32 1.0, %v318_v13 }
 0x324   :  { %319 = vrcp.f32 %v205_v14 }
 0x32e   :  { %v320_v15 = vpop.eup %319 }
 0x32f   :  { %v208_v16 = vsub.f32 1.0, %v320_v15 }
 0x331   :  { %210 = vrot.lane.b32.xlu1 %v208_v16, %s329_s3 }
 0x3a3   :  { %v211_v17 = vpop.permute.xlu1 %210 }
 0x3a4   :  { %v214_v18 = vsel %vm213_vm1, %v320_v15, %v211_v17 }
 0x3a5   :  { %216 = vst.msk [vmem:[%s446_s7] sm:$0xff] %vm215_vm2, %v214_v18 }

</bundles_post_ra>
